<compile_context>
chip_gen: v7x
topology: tpu7x:2x2x1
jax: 0.10.0
libtpu: 0.0.40
codegen_flags: <defaults>
</compile_context>

<pallas_src>
import functools

import numpy as np
import jax
import jax.numpy as jnp
from jax.experimental import pallas as pl
from jax.experimental.pallas import tpu as pltpu

_LANE = 128


def _round_up(x, m):
    return ((x + m - 1) // m) * m


@functools.lru_cache(maxsize=None)
def _stacked_ancestor_mask(depth, n_pad, out_lanes):
    """(2*n_pad, out_lanes) mask [ML; MR] with leaf columns offset by num_nodes.

    ML[n, num_nodes+l] = 1 if node n is a left-ancestor of leaf l (BFS order),
    MR (rows n_pad..) likewise for right-ancestors.  Column offset packs the
    leaf path-probs right after the node lanes in the kernel output.
    """
    num_nodes = 2 ** depth - 1
    num_leaves = 2 ** depth
    ms = np.zeros((2 * n_pad, out_lanes), np.float32)
    for leaf in range(num_leaves):
        j = num_nodes + leaf                 # BFS index of this leaf in the full tree
        col = num_nodes + leaf               # packed output lane for this leaf
        while j > 0:
            parent = (j - 1) // 2
            if j == 2 * parent + 1:
                ms[parent, col] = 1.0        # left subtree  -> factor p
            else:
                ms[n_pad + parent, col] = 1.0  # right subtree -> factor (1-p)
            j = parent
    return ms


def _pick_tb(b_pad):
    """Batch tile: multiple of 128, <=512, and >=2 grid steps when possible."""
    for cand in (512, 256, 128):
        if b_pad % cand == 0 and b_pad // cand >= 2:
            return cand
    return min(b_pad, 512)


def _sdt_kernel(x_ref, w_ref, b_ref, ms_ref, out_ref, *, num_nodes, n_pad):
    # x_ref:  (TB, F_pad)        bf16 batch tile
    # w_ref:  (F_pad, N_pad)     bf16 stacked beta-folded node weights
    # b_ref:  (1, N_pad)         f32 beta-folded biases
    # ms_ref: (2*N_pad, OUT)     f32 stacked [ML; MR] ancestor mask (leaf cols offset)
    # out_ref:(TB, OUT)          f32 packed [probs | leaf_path_probs]
    tb, out_lanes = out_ref.shape

    # One bf16 MXU matmul covers every inner node's Linear(F, 1); f32 accumulate.
    z = jnp.dot(x_ref[...], w_ref[...], preferred_element_type=jnp.float32) + b_ref[...]

    # log-sigmoid identities (exact in z, no clip, fewer EUP ops).
    lp = jnp.minimum(z, 0.0) - jnp.log(1.0 + jnp.exp(-jnp.abs(z)))   # log p
    l1p = lp - z                                                     # log (1-p)
    probs = jnp.exp(lp)                                              # (TB, N_pad)

    # Leaf path probabilities: single fused mask matmul (K = 2*N_pad), then exp.
    # Leaf columns land in lanes [num_nodes, num_nodes + num_leaves); others are 1.
    log_leaf = jnp.dot(jnp.concatenate([lp, l1p], axis=-1), ms_ref[...],
                       preferred_element_type=jnp.float32)           # (TB, OUT)
    leaf_vals = jnp.exp(log_leaf)

    # Packed lane-dense store: probs in lanes [0, num_nodes), leaf probs after.
    lane = jax.lax.broadcasted_iota(jnp.int32, (tb, n_pad), 1)
    out_ref[:, :n_pad] = jnp.where(lane < num_nodes, probs, leaf_vals[:, :n_pad])
    if out_lanes > n_pad:                      # only needed for depth >= 7
        out_ref[:, n_pad:] = leaf_vals[:, n_pad:]


def soft_decision_tree_forward(x, w, b, beta, pp0=None, *, depth):
    """SoftDecisionTree.forward.

    Args:
      x:    (B, F)  flattened inputs.
      w:    (N, F)  stacked nn.Linear(F,1) weights of the 2^depth-1 inner nodes (BFS order).
      b:    (N,)    stacked biases.
      beta: (N,)    per-node beta parameters.
      pp0:  optional (B, 1) path prob passed to the root (None == ones).
    Returns (probs, alphas, leaf_path_probs) with shapes (B,N), (B,N), (B,2^depth).
    """
    B, F = x.shape
    num_nodes = 2 ** depth - 1
    num_leaves = 2 ** depth

    n_pad = _round_up(num_nodes, _LANE)
    out_lanes = _round_up(num_nodes + num_leaves, _LANE)
    f_pad = _round_up(F, _LANE)

    # Fold beta into the Linear: sigmoid(beta*(xW^T + b)) == sigmoid(x(beta*W)^T + beta*b).
    w_eff = beta.astype(jnp.float32)[:, None] * w.astype(jnp.float32)   # (N, F)
    b_eff = beta.astype(jnp.float32) * b.astype(jnp.float32)            # (N,)

    # bf16 MXU operands, lane/K padded; bias stays f32.
    w_t = jnp.zeros((f_pad, n_pad), jnp.bfloat16).at[:F, :num_nodes].set(
        w_eff.T.astype(jnp.bfloat16))
    b2 = jnp.zeros((1, n_pad), jnp.float32).at[:, :num_nodes].set(b_eff)

    ms = jnp.asarray(_stacked_ancestor_mask(depth, n_pad, out_lanes))   # cached numpy

    # Adaptive batch tiling (no 256-row padding of tiny batches).
    b_pad = max(_round_up(B, _LANE), _LANE)
    tb = _pick_tb(b_pad)
    x_p = jnp.zeros((b_pad, f_pad), jnp.bfloat16).at[:B, :F].set(x.astype(jnp.bfloat16))

    out = pl.pallas_call(
        functools.partial(_sdt_kernel, num_nodes=num_nodes, n_pad=n_pad),
        out_shape=jax.ShapeDtypeStruct((b_pad, out_lanes), jnp.float32),
        grid=(b_pad // tb,),
        in_specs=[
            pl.BlockSpec((tb, f_pad), lambda i: (i, 0)),
            pl.BlockSpec((f_pad, n_pad), lambda i: (0, 0)),      # constant index map:
            pl.BlockSpec((1, n_pad), lambda i: (0, 0)),          #   fetched once across
            pl.BlockSpec((2 * n_pad, out_lanes), lambda i: (0, 0)),  # the batch grid
        ],
        out_specs=pl.BlockSpec((tb, out_lanes), lambda i: (i, 0)),
        compiler_params=pltpu.CompilerParams(
            dimension_semantics=("parallel",)),
    )(x_p, w_t, b2, ms)

    probs = out[:B, :num_nodes]
    leaf_pp = out[:B, num_nodes:num_nodes + num_leaves]
    if pp0 is not None:
        # Normal case pp0 == ones; applied here so the kernel stays pp0-free.
        leaf_pp = leaf_pp * pp0.astype(jnp.float32)
    alphas = probs  # sum(prob*pp,1)/sum(pp,1) with a (B,1) pp column == prob (pp > 0)
    return probs, alphas, leaf_pp


def _reference_forward(x, w, b, beta, pp0, depth, match_bf16=False):
    """Plain-JAX mirror of the recursive PyTorch forward (BFS order)."""
    num_nodes = 2 ** depth - 1
    w_eff = beta[:, None] * w
    b_eff = beta * b
    if match_bf16:
        x = x.astype(jnp.bfloat16).astype(jnp.float32)
        w_eff = w_eff.astype(jnp.bfloat16).astype(jnp.float32)
    z = x @ w_eff.T + b_eff[None, :]
    probs = jax.nn.sigmoid(z)
    path = [None] * (2 * num_nodes + 1)
    path[0] = pp0
    for i in range(num_nodes):
        p = probs[:, i:i + 1]
        path[2 * i + 1] = path[i] * p
        path[2 * i + 2] = path[i] * (1.0 - p)
    leaf_pp = jnp.concatenate(path[num_nodes:], axis=1)
    return probs, probs, leaf_pp


if __name__ == "__main__":
    depth = 3            # SoftDecisionTree(depth=3, ...): 7 inner nodes, 8 leaves
    input_size = 32
    batch = 16
    # TODO(synk): Leaf distribution softmax / get_loss / get_penalty are
    # training-side reductions outside SoftDecisionTree.forward; not kernelized.

    num_nodes = 2 ** depth - 1
    num_leaves = 2 ** depth

    key = jax.random.PRNGKey(0)
    kx, kw, kb, kbeta = jax.random.split(key, 4)
    x = jax.random.normal(kx, (batch, input_size), dtype=jnp.float32)
    # Stand-ins for the stacked nn.Linear(input_size, 1) weights/biases and the
    # nn.Parameter(torch.rand(1)) betas of every inner node (BFS order).
    w = jax.random.uniform(kw, (num_nodes, input_size), dtype=jnp.float32,
                           minval=-0.1, maxval=0.1)
    b = jax.random.uniform(kb, (num_nodes,), dtype=jnp.float32,
                           minval=-0.1, maxval=0.1)
    beta = jax.random.uniform(kbeta, (num_nodes,), dtype=jnp.float32)
    pp0 = jnp.ones((batch, 1), dtype=jnp.float32)   # path_prob passed to the root

    fwd = jax.jit(functools.partial(soft_decision_tree_forward, depth=depth))
    probs, alphas, leaf_pp = fwd(x, w, b, beta, pp0)
    jax.block_until_ready((probs, alphas, leaf_pp))

    assert probs.shape == (batch, num_nodes)
    assert leaf_pp.shape == (batch, num_leaves)

    # Tight check against a reference using the same bf16 operand rounding.
    probs_m, alphas_m, leaf_m = _reference_forward(x, w, b, beta, pp0, depth,
                                                   match_bf16=True)
    assert jnp.allclose(probs, probs_m, atol=1e-4, rtol=1e-4)
    assert jnp.allclose(alphas, alphas_m, atol=1e-4, rtol=1e-4)
    assert jnp.allclose(leaf_pp, leaf_m, atol=1e-4, rtol=1e-4)

    # Looser check against the pure-f32 PyTorch-equivalent math.
    probs_r, alphas_r, leaf_r = _reference_forward(x, w, b, beta, pp0, depth)
    assert jnp.allclose(probs, probs_r, atol=5e-3, rtol=5e-3)
    assert jnp.allclose(alphas, alphas_r, atol=5e-3, rtol=5e-3)
    assert jnp.allclose(leaf_pp, leaf_r, atol=5e-3, rtol=5e-3)

    # Leaf path probabilities partition the initial path prob (sum == 1),
    # independent of bf16 weight rounding.
    assert jnp.allclose(jnp.sum(leaf_pp, axis=1), jnp.ones((batch,)), atol=1e-4)
    assert not jnp.any(jnp.isnan(alphas))

    print("KERNEL_OK")
</pallas_src>

<mosaic_0001>
module attributes {stable_mosaic.version = 11 : i64} {
  func.func @_sdt_kernel(%arg0: i32, %arg1: memref<128x128xbf16, #tpu.memory_space<vmem>>, %arg2: memref<128x128xbf16, #tpu.memory_space<vmem>>, %arg3: memref<1x128xf32, #tpu.memory_space<vmem>>, %arg4: memref<256x128xf32, #tpu.memory_space<vmem>>, %arg5: memref<128x128xf32, #tpu.memory_space<vmem>>) attributes {dimension_semantics = [#tpu.dimension_semantics<parallel>], iteration_bounds = array<i64: 1>, scalar_prefetch = 0 : i64, scratch_operands = 0 : i64, tpu.core_type = #tpu.core_type<tc>, window_params = [{transform_indices = @transform_0, window_bounds = array<i64: 128, 128>}, {pipeline_mode = #tpu.pipeline_mode<synchronous>, transform_indices = @transform_1, window_bounds = array<i64: 128, 128>}, {pipeline_mode = #tpu.pipeline_mode<synchronous>, transform_indices = @transform_2, window_bounds = array<i64: 1, 128>}, {pipeline_mode = #tpu.pipeline_mode<synchronous>, transform_indices = @transform_3, window_bounds = array<i64: 256, 128>}, {transform_indices = @transform_4, window_bounds = array<i64: 128, 128>}]} {
    %c0 = arith.constant 0 : index
    %c0_0 = arith.constant 0 : index
    %0 = vector.load %arg1[%c0, %c0_0] : memref<128x128xbf16, #tpu.memory_space<vmem>>, vector<128x128xbf16>
    %c0_1 = arith.constant 0 : index
    %c0_2 = arith.constant 0 : index
    %1 = vector.load %arg2[%c0_1, %c0_2] : memref<128x128xbf16, #tpu.memory_space<vmem>>, vector<128x128xbf16>
    %cst = arith.constant dense<0.000000e+00> : vector<128x128xf32>
    %2 = tpu.matmul %0, %1, %cst {dimension_numbers = #tpu.dot_dimension_numbers<[1], [0], [0], [1], [0, 0, 1, 1], [], []>} : vector<128x128xbf16>, vector<128x128xbf16>, vector<128x128xf32> -> vector<128x128xf32>
    %c0_3 = arith.constant 0 : index
    %c0_4 = arith.constant 0 : index
    %3 = vector.load %arg3[%c0_3, %c0_4] : memref<1x128xf32, #tpu.memory_space<vmem>>, vector<1x128xf32>
    %4 = vector.broadcast %3 : vector<1x128xf32> to vector<128x128xf32>
    %5 = arith.addf %2, %4 : vector<128x128xf32>
    %cst_5 = arith.constant 0.000000e+00 : f32
    %6 = vector.broadcast %cst_5 : f32 to vector<128x128xf32>
    %7 = arith.minimumf %5, %6 : vector<128x128xf32>
    %8 = math.absf %5 : vector<128x128xf32>
    %cst_6 = arith.constant 0.000000e+00 : f32
    %9 = vector.broadcast %cst_6 : f32 to vector<128x128xf32>
    %10 = arith.subf %9, %8 : vector<128x128xf32>
    %11 = math.exp %10 : vector<128x128xf32>
    %cst_7 = arith.constant 1.000000e+00 : f32
    %12 = vector.broadcast %cst_7 : f32 to vector<128x128xf32>
    %13 = arith.addf %12, %11 : vector<128x128xf32>
    %14 = math.log %13 : vector<128x128xf32>
    %15 = arith.subf %7, %14 : vector<128x128xf32>
    %16 = arith.subf %15, %5 : vector<128x128xf32>
    %17 = math.exp %15 : vector<128x128xf32>
    %18 = tpu.concatenate %15, %16 in 1 : vector<128x128xf32>, vector<128x128xf32> -> vector<128x256xf32>
    %c0_8 = arith.constant 0 : index
    %c0_9 = arith.constant 0 : index
    %19 = vector.load %arg4[%c0_8, %c0_9] : memref<256x128xf32, #tpu.memory_space<vmem>>, vector<256x128xf32>
    %cst_10 = arith.constant dense<0.000000e+00> : vector<128x128xf32>
    %20 = tpu.matmul %18, %19, %cst_10 {dimension_numbers = #tpu.dot_dimension_numbers<[1], [0], [0], [1], [0, 0, 1, 1], [], []>} : vector<128x256xf32>, vector<256x128xf32>, vector<128x128xf32> -> vector<128x128xf32>
    %21 = math.exp %20 : vector<128x128xf32>
    %22 = tpu.iota {dimensions = array<i32: 1>} : vector<128x128xi32>
    %c7_i32 = arith.constant 7 : i32
    %23 = vector.broadcast %c7_i32 : i32 to vector<128x128xi32>
    %24 = arith.cmpi slt, %22, %23 : vector<128x128xi32>
    %25 = arith.select %24, %17, %21 : vector<128x128xi1>, vector<128x128xf32>
    %c0_11 = arith.constant 0 : index
    %c0_12 = arith.constant 0 : index
    %26 = vector.load %arg5[%c0_11, %c0_12] : memref<128x128xf32, #tpu.memory_space<vmem>>, vector<128x128xf32>
    tpu.vector_store %arg5[%c0_11, %c0_12], %25 {strides = array<i32>} : memref<128x128xf32, #tpu.memory_space<vmem>>, vector<128x128xf32>,
    return
  }
  func.func @transform_0(%arg0: i32) -> (i32, i32) {
    %c0_i32 = arith.constant 0 : i32
    %c0_i32_0 = arith.constant 0 : i32
    return %arg0, %c0_i32 : i32, i32
  }
  func.func @transform_1(%arg0: i32) -> (i32, i32) {
    %c0_i32 = arith.constant 0 : i32
    %c0_i32_0 = arith.constant 0 : i32
    %c0_i32_1 = arith.constant 0 : i32
    return %c0_i32, %c0_i32_0 : i32, i32
  }
  func.func @transform_2(%arg0: i32) -> (i32, i32) {
    %c0_i32 = arith.constant 0 : i32
    %c0_i32_0 = arith.constant 0 : i32
    %c0_i32_1 = arith.constant 0 : i32
    return %c0_i32, %c0_i32_0 : i32, i32
  }
  func.func @transform_3(%arg0: i32) -> (i32, i32) {
    %c0_i32 = arith.constant 0 : i32
    %c0_i32_0 = arith.constant 0 : i32
    %c0_i32_1 = arith.constant 0 : i32
    return %c0_i32, %c0_i32_0 : i32, i32
  }
  func.func @transform_4(%arg0: i32) -> (i32, i32) {
    %c0_i32 = arith.constant 0 : i32
    %c0_i32_0 = arith.constant 0 : i32
    return %arg0, %c0_i32 : i32, i32
  }
}

</mosaic_0001>

<bundles_post_ra>
// kernel: soft_decision_tree_forward.1
= control target key start
LH: loop header
LB: loop body
LE: loop exit
PB: predicated region body
PF: predicated region fallthrough
CT: control target
= control target key end

     0   :  { %s1460_s1 = inlined_call_operand.vmem [shape: bf16[128,128], index: 1, kind: input, shape index: {}]   ;;  %s1461_s0 = inlined_call_operand.vmem [shape: bf16[128,128], index: 0, kind: input, shape index: {}]   ;;  %s1462_s3 = inlined_call_operand.vmem [shape: f32[256,128], index: 3, kind: input, shape index: {}]   ;;  %s1463_s2 = inlined_call_operand.vmem [shape: f32[1,128], index: 2, kind: input, shape index: {}]   ;;  %s1464_s4 = inlined_call_operand.vmem [shape: f32[128,128], index: 4, kind: output, shape index: {}]  }
   0x1   :  { %v883_v0 = vld [vmem:[%s1460_s1] sm:$0xff]   ;;  %v884_v1 = vld [vmem:[%s1460_s1 + $0x8] sm:$0xff]   ;;  %v885_v2 = vld [vmem:[%s1460_s1 + $0x10] sm:$0xff]  }
   0x2   :  { %803 = vmatprep.subr.bf16.mxu0 %v883_v0  ;;  %v886_v3 = vld [vmem:[%s1460_s1 + $0x18] sm:$0xff]   ;;  %v891_v4 = vld [vmem:[%s1461_s0] sm:$0xff]   ;;  %v888_v6 = vld [vmem:[%s1460_s1 + $0x28] sm:$0xff]  }
   0x3   :  { %804 = vmatpush3.bf16.msra.mxu0 %v883_v0  ;;  %819 = vmatprep.mubr.bf16.mxu0 %v891_v4  ;;  %v887_v5 = vld [vmem:[%s1460_s1 + $0x20] sm:$0xff]   ;;  %v889_v7 = vld [vmem:[%s1460_s1 + $0x30] sm:$0xff]   ;;  %v890_v8 = vld [vmem:[%s1460_s1 + $0x38] sm:$0xff]  }
   0x4   :  { %805 = vmatprep.subr.bf16.mxu0 %v884_v1  ;;  %v892_v9 = vld [vmem:[%s1461_s0 + $0x8] sm:$0xff]   ;;  %v893_v10 = vld [vmem:[%s1461_s0 + $0x10] sm:$0xff]   ;;  %v894_v11 = vld [vmem:[%s1461_s0 + $0x18] sm:$0xff]  }
   0x5   :  { %v895_v12 = vld [vmem:[%s1461_s0 + $0x20] sm:$0xff]   ;;  %v896_v13 = vld [vmem:[%s1461_s0 + $0x28] sm:$0xff]   ;;  %v897_v14 = vld [vmem:[%s1461_s0 + $0x30] sm:$0xff]  }
   0x6   :  { %v898_v15 = vld [vmem:[%s1461_s0 + $0x38] sm:$0xff]   ;;  %v458_v16 = vld [vmem:[%s1462_s3 + $0x80] sm:$0xff]  ;;  %v459_v17 = vld [vmem:[%s1462_s3 + $0x88] sm:$0xff] }
   0x7   :  { %806 = vmatpush3.bf16.msra.mxu0 %v884_v1  ;;  %v835_v18 = vpack.c.bf16 %v459_v17, %v458_v16  ;;  %v442_v19 = vld [vmem:[%s1462_s3] sm:$0xff]  ;;  %v443_v20 = vld [vmem:[%s1462_s3 + $0x8] sm:$0xff]  ;;  %v460_v22 = vld [vmem:[%s1462_s3 + $0x90] sm:$0xff] }
   0x8   :  { %807 = vmatprep.subr.bf16.mxu0 %v885_v2  ;;  %v837_v21 = vpack.c.bf16 %v443_v20, %v442_v19  ;;  %v461_v23 = vld [vmem:[%s1462_s3 + $0x98] sm:$0xff]  ;;  %v444_v25 = vld [vmem:[%s1462_s3 + $0x10] sm:$0xff]  ;;  %v462_v28 = vld [vmem:[%s1462_s3 + $0xa0] sm:$0xff] }
   0x9   :  { %867 = vmatprep.subr.bf16.mxu1 %v835_v18  ;;  %v839_v24 = vpack.c.bf16 %v461_v23, %v460_v22  ;;  %v445_v26 = vld [vmem:[%s1462_s3 + $0x18] sm:$0xff]  ;;  %v463_v29 = vld [vmem:[%s1462_s3 + $0xa8] sm:$0xff]  ;;  %v446_v31 = vld [vmem:[%s1462_s3 + $0x20] sm:$0xff] }
   0xa   :  { %875 = vmatpush3.bf16.msra.mxu1 %v837_v21  ;;  %v841_v27 = vpack.c.bf16 %v445_v26, %v444_v25  ;;  %v843_v30 = vpack.c.bf16 %v463_v29, %v462_v28  ;;  %v447_v32 = vld [vmem:[%s1462_s3 + $0x28] sm:$0xff]  ;;  %v464_v34 = vld [vmem:[%s1462_s3 + $0xb0] sm:$0xff]  ;;  %v465_v35 = vld [vmem:[%s1462_s3 + $0xb8] sm:$0xff] }
   0xb   :  { %808 = vmatpush3.bf16.msra.mxu0 %v885_v2  ;;  %868 = vmatprep.subr.bf16.mxu1 %v839_v24  ;;  %v845_v33 = vpack.c.bf16 %v447_v32, %v446_v31  ;;  %v847_v36 = vpack.c.bf16 %v465_v35, %v464_v34  ;;  %v448_v37 = vld [vmem:[%s1462_s3 + $0x30] sm:$0xff]  ;;  %v449_v38 = vld [vmem:[%s1462_s3 + $0x38] sm:$0xff]  ;;  %v466_v40 = vld [vmem:[%s1462_s3 + $0xc0] sm:$0xff] }
   0xc   :  { %809 = vmatprep.subr.bf16.mxu0 %v886_v3  ;;  %v849_v39 = vpack.c.bf16 %v449_v38, %v448_v37  ;;  %v467_v41 = vld [vmem:[%s1462_s3 + $0xc8] sm:$0xff]  ;;  %v450_v43 = vld [vmem:[%s1462_s3 + $0x40] sm:$0xff]  ;;  %v468_v46 = vld [vmem:[%s1462_s3 + $0xd0] sm:$0xff] }
   0xd   :  { %v851_v42 = vpack.c.bf16 %v467_v41, %v466_v40  ;;  %v451_v44 = vld [vmem:[%s1462_s3 + $0x48] sm:$0xff]  ;;  %v469_v47 = vld [vmem:[%s1462_s3 + $0xd8] sm:$0xff]  ;;  %v452_v49 = vld [vmem:[%s1462_s3 + $0x50] sm:$0xff] }
   0xe   :  { %876 = vmatpush3.bf16.msra.mxu1 %v841_v27  ;;  %v853_v45 = vpack.c.bf16 %v451_v44, %v450_v43  ;;  %v855_v48 = vpack.c.bf16 %v469_v47, %v468_v46  ;;  %v453_v50 = vld [vmem:[%s1462_s3 + $0x58] sm:$0xff]  ;;  %v470_v52 = vld [vmem:[%s1462_s3 + $0xe0] sm:$0xff]  ;;  %v471_v53 = vld [vmem:[%s1462_s3 + $0xe8] sm:$0xff] }
   0xf   :  { %810 = vmatpush3.bf16.msra.mxu0 %v886_v3  ;;  %869 = vmatprep.subr.bf16.mxu1 %v843_v30  ;;  %v857_v51 = vpack.c.bf16 %v453_v50, %v452_v49  ;;  %v859_v54 = vpack.c.bf16 %v471_v53, %v470_v52  ;;  %v454_v55 = vld [vmem:[%s1462_s3 + $0x60] sm:$0xff]  ;;  %v455_v56 = vld [vmem:[%s1462_s3 + $0x68] sm:$0xff]  ;;  %v472_v58 = vld [vmem:[%s1462_s3 + $0xf0] sm:$0xff] }
  0x10   :  { %811 = vmatprep.subr.bf16.mxu0 %v887_v5  ;;  %v861_v57 = vpack.c.bf16 %v455_v56, %v454_v55  ;;  %v473_v59 = vld [vmem:[%s1462_s3 + $0xf8] sm:$0xff]  ;;  %v456_v61 = vld [vmem:[%s1462_s3 + $0x70] sm:$0xff]  ;;  %v1199_v0 = vld [vmem:[%s1463_s2] ss:$0 sm:$0xff] }
  0x11   :  { %v863_v60 = vpack.c.bf16 %v473_v59, %v472_v58  ;;  %v457_v62 = vld [vmem:[%s1462_s3 + $0x78] sm:$0xff] }
  0x12   :  { %877 = vmatpush3.bf16.msra.mxu1 %v845_v33  ;;  %v865_v63 = vpack.c.bf16 %v457_v62, %v456_v61 }
  0x13   :  { %812 = vmatpush3.bf16.msra.mxu0 %v887_v5  ;;  %870 = vmatprep.subr.bf16.mxu1 %v847_v36 }
  0x14   :  { %813 = vmatprep.subr.bf16.mxu0 %v888_v6 }
  0x16   :  { %878 = vmatpush3.bf16.msra.mxu1 %v849_v39 }
  0x17   :  { %814 = vmatpush3.bf16.msra.mxu0 %v888_v6  ;;  %871 = vmatprep.subr.bf16.mxu1 %v851_v42 }
  0x18   :  { %815 = vmatprep.subr.bf16.mxu0 %v889_v7 }
  0x1a   :  { %879 = vmatpush3.bf16.msra.mxu1 %v853_v45 }
  0x1b   :  { %816 = vmatpush3.bf16.msra.mxu0 %v889_v7  ;;  %872 = vmatprep.subr.bf16.mxu1 %v855_v48 }
  0x1c   :  { %817 = vmatprep.subr.bf16.mxu0 %v890_v8 }
  0x1e   :  { %880 = vmatpush3.bf16.msra.mxu1 %v857_v51 }
  0x1f   :  { %818 = vmatpush3.bf16.msra.mxu0 %v890_v8  ;;  %873 = vmatprep.subr.bf16.mxu1 %v859_v54 }
  0x20   :  { %836 = vmatprep.subr.bf16.mxu0 %v835_v18 }
  0x22   :  { %820 = vmatmul.mubr.bf16.vlgmr.msra.gmra.mrb[0].mxu0 %v892_v9  ;;  %881 = vmatpush3.bf16.msra.mxu1 %v861_v57 }
  0x23   :  { %823 = vmatprep.mubr.bf16.mxu0 %v893_v10  ;;  %838 = vmatpush3.bf16.msra.mxu0 %v837_v21 }
  0x24   :  { %840 = vmatprep.subr.bf16.mxu0 %v839_v24  ;;  %874 = vmatprep.subr.bf16.mxu1 %v863_v60 }
  0x26   :  { %882 = vmatpush3.bf16.msra.mxu1 %v865_v63 }
  0x27   :  { %842 = vmatpush3.bf16.msra.mxu0 %v841_v27 }
  0x28   :  { %844 = vmatprep.subr.bf16.mxu0 %v843_v30 }
  0x2a   :  { %824 = vmatmul.mubr.bf16.gmra.mrb[4].mxu0 %v894_v11 }
  0x2b   :  { %827 = vmatprep.mubr.bf16.mxu0 %v895_v12  ;;  %846 = vmatpush3.bf16.msra.mxu0 %v845_v33 }
  0x2c   :  { %848 = vmatprep.subr.bf16.mxu0 %v847_v36 }
  0x2f   :  { %850 = vmatpush3.bf16.msra.mxu0 %v849_v39 }
  0x30   :  { %852 = vmatprep.subr.bf16.mxu0 %v851_v42 }
  0x32   :  { %828 = vmatmul.mubr.bf16.gmra.mrb[8].mxu0 %v896_v13 }
  0x33   :  { %831 = vmatprep.mubr.bf16.mxu0 %v897_v14  ;;  %854 = vmatpush3.bf16.msra.mxu0 %v853_v45 }
  0x34   :  { %856 = vmatprep.subr.bf16.mxu0 %v855_v48 }
  0x37   :  { %858 = vmatpush3.bf16.msra.mxu0 %v857_v51 }
  0x38   :  { %860 = vmatprep.subr.bf16.mxu0 %v859_v54 }
  0x3a   :  { %832 = vmatmul.mubr.bf16.gmra.mrb[12].mxu0 %v898_v15 }
  0x3b   :  { %862 = vmatpush3.bf16.msra.mxu0 %v861_v57 }
  0x3c   :  { %864 = vmatprep.subr.bf16.mxu0 %v863_v60 }
  0x3f   :  { %866 = vmatpush3.bf16.msra.mxu0 %v865_v63 }
  0xf5   :  { %v821_v1 = vpop.f32.mrb[0].mxu0 }
  0xf6   :  { %v1202_v2 = vadd.f32 %v821_v1, %v1199_v0  ;;  %v187_v3 = vpop.f32.mrb[1].mxu0 }
  0xf7   :  { %v1205_v4 = vadd.f32 %v1199_v0, %v187_v3  ;;  %v822_v5 = vpop.f32.mrb[2].mxu0 }
  0xf8   :  { %v268_v6 = vand.u32 2147483647, %v1202_v2  ;;  %v1209_v7 = vadd.f32 %v822_v5, %v1199_v0  ;;  %v190_v8 = vpop.f32.mrb[3].mxu0 }
  0xf9   :  { %v266_v9 = vand.u32 2147483647, %v1205_v4  ;;  %v1213_v10 = vadd.f32 %v1199_v0, %v190_v8  ;;  %v250_v1 = vmin.f32 %v1205_v4, 0.0 }
  0xfa   :  { %v284_v11 = vsub.f32 0.0, %v268_v6  ;;  %v269_v12 = vand.u32 2147483647, %v1209_v7 }
  0xfb   :  { %v282_v13 = vsub.f32 0.0, %v266_v9  ;;  %v267_v14 = vand.u32 2147483647, %v1213_v10  ;;  %v251_v6 = vmin.f32 %v1213_v10, 0.0 }
  0xfc   :  { %v302_v15 = vmul.f32 1.442695, %v284_v11  ;;  %v285_v16 = vsub.f32 0.0, %v269_v12 }
  0xfd   :  { %v298_v17 = vmul.f32 1.442695, %v282_v13  ;;  %v283_v18 = vsub.f32 0.0, %v267_v14  ;;  %v825_v19 = vpop.f32.mrb[4].mxu0 }
  0xfe   :  { %899 = vpow2.f32 %v302_v15  ;;  %v304_v20 = vmul.f32 1.442695, %v285_v16  ;;  %v203_v21 = vpop.f32.mrb[5].mxu0  ;;  %v1221_v30 = vadd.f32 %v825_v19, %v1199_v0 }
  0xff   :  { %901 = vpow2.f32 %v298_v17  ;;  %v300_v22 = vmul.f32 1.442695, %v283_v18  ;;  %v826_v23 = vpop.f32.mrb[6].mxu0  ;;  %v1225_v37 = vadd.f32 %v1199_v0, %v203_v21  ;;  %v252_v18 = vmin.f32 %v1202_v2, 0.0 }
 0x100   :  { %903 = vpow2.f32 %v304_v20  ;;  %v206_v24 = vpop.f32.mrb[7].mxu0  ;;  %v272_v40 = vand.u32 2147483647, %v1221_v30  ;;  %v1229_v43 = vadd.f32 %v826_v23, %v1199_v0 }
 0x101   :  { %905 = vpow2.f32 %v300_v22  ;;  %v1218_v25 = vadd.f32 %v1199_v0, %v206_v24  ;;  %v270_v45 = vand.u32 2147483647, %v1225_v37 }
 0x102   :  { %v288_v49 = vsub.f32 0.0, %v272_v40  ;;  %v273_v53 = vand.u32 2147483647, %v1229_v43 }
 0x103   :  { %v271_v31 = vand.u32 2147483647, %v1218_v25  ;;  %v286_v54 = vsub.f32 0.0, %v270_v45 }
 0x104   :  { %v310_v57 = vmul.f32 1.442695, %v288_v49  ;;  %v289_v58 = vsub.f32 0.0, %v273_v53 }
 0x105   :  { %v829_v26 = vpop.f32.mrb[8].mxu0  ;;  %v287_v41 = vsub.f32 0.0, %v271_v31  ;;  %v306_v60 = vmul.f32 1.442695, %v286_v54 }
 0x106   :  { %v219_v27 = vpop.f32.mrb[9].mxu0  ;;  %v312_v11 = vmul.f32 1.442695, %v289_v58  ;;  %v1254_v12 = vadd.f32 %v829_v26, %v1199_v0 }
 0x107   :  { %v830_v28 = vpop.f32.mrb[10].mxu0  ;;  %v308_v50 = vmul.f32 1.442695, %v287_v41  ;;  %v1240_v55 = vadd.f32 %v1199_v0, %v219_v27 }
 0x108   :  { %v900_v29 = vpop.eup %899  ;;  %v222_v32 = vpop.f32.mrb[11].mxu0  ;;  %v276_v20 = vand.u32 2147483647, %v1254_v12  ;;  %v1264_v21 = vadd.f32 %v830_v28, %v1199_v0 }
 0x109   :  { %v902_v33 = vpop.eup %901  ;;  %v332_v34 = vadd.f32 1.0, %v900_v29  ;;  %v274_v61 = vand.u32 2147483647, %v1240_v55  ;;  %v1247_v62 = vadd.f32 %v1199_v0, %v222_v32 }
 0x10a   :  { %v904_v35 = vpop.eup %903  ;;  %v330_v36 = vadd.f32 1.0, %v902_v33  ;;  %v292_v32 = vsub.f32 0.0, %v276_v20  ;;  %v277_v28 = vand.u32 2147483647, %v1264_v21 }
 0x10b   :  { %v906_v38 = vpop.eup %905  ;;  %v333_v42 = vadd.f32 1.0, %v904_v35  ;;  %v290_v14 = vsub.f32 0.0, %v274_v61  ;;  %v275_v15 = vand.u32 2147483647, %v1247_v62 }
 0x10c   :  { %907 = vlog2.f32 %v330_v36  ;;  %v331_v39 = vadd.f32 1.0, %v906_v38  ;;  %v293_v40 = vsub.f32 0.0, %v277_v28 }
 0x10d   :  { %909 = vlog2.f32 %v332_v34  ;;  %v833_v44 = vpop.f32.mrb[12].mxu0  ;;  %v314_v27 = vmul.f32 1.442695, %v290_v14  ;;  %v291_v29 = vsub.f32 0.0, %v275_v15 }
 0x10e   :  { %911 = vlog2.f32 %v331_v39  ;;  %v1233_v46 = vadd.f32 %v833_v44, %v1199_v0  ;;  %v235_v47 = vpop.f32.mrb[13].mxu0  ;;  %v318_v39 = vmul.f32 1.442695, %v292_v32 }
 0x10f   :  { %v834_v48 = vpop.f32.mrb[14].mxu0  ;;  %913 = vlog2.f32 %v333_v42  ;;  %v1274_v33 = vadd.f32 %v1199_v0, %v235_v47  ;;  %v316_v35 = vmul.f32 1.442695, %v291_v29 }
 0x110   :  { %v1236_v51 = vadd.f32 %v834_v48, %v1199_v0  ;;  %v238_v52 = vpop.f32.mrb[15].mxu0  ;;  %915 = vpow2.f32 %v308_v50 }
 0x111   :  { %v1243_v56 = vadd.f32 %v1199_v0, %v238_v52  ;;  %917 = vpow2.f32 %v310_v57  ;;  %v278_v0 = vand.u32 2147483647, %v1274_v33  ;;  %v280_v52 = vand.u32 2147483647, %v1233_v46 }
 0x112   :  { %919 = vpow2.f32 %v306_v60  ;;  %v281_v61 = vand.u32 2147483647, %v1236_v51 }
 0x113   :  { %921 = vpow2.f32 %v312_v11  ;;  %v294_v47 = vsub.f32 0.0, %v278_v0  ;;  %v279_v48 = vand.u32 2147483647, %v1243_v56  ;;  %v254_v11 = vmin.f32 %v1225_v37, 0.0 }
 0x114   :  { %923 = vpow2.f32 %v314_v27  ;;  %v297_v15 = vsub.f32 0.0, %v281_v61  ;;  %v258_v0 = vmin.f32 %v1240_v55, 0.0 }
 0x115   :  { %v295_v53 = vsub.f32 0.0, %v279_v48 }
 0x116   :  { %v908_v59 = vpop.eup %907  ;;  %v328_v27 = vmul.f32 1.442695, %v297_v15  ;;  %v263_v15 = vmin.f32 %v1243_v56, 0.0 }
 0x117   :  { %v910_v63 = vpop.eup %909  ;;  %v347_v3 = vmul.f32 0.6931472, %v908_v59  ;;  %v296_v59 = vsub.f32 0.0, %v280_v52 }
 0x118   :  { %v912_v5 = vpop.eup %911  ;;  %v351_v13 = vmul.f32 0.6931472, %v910_v63  ;;  %v324_v63 = vmul.f32 1.442695, %v295_v53 }
 0x119   :  { %v1251_v8 = vsub.f32 %v250_v1, %v347_v3  ;;  %v349_v9 = vmul.f32 0.6931472, %v912_v5  ;;  %v914_v16 = vpop.eup %913 }
 0x11a   :  { %v916_v23 = vpop.eup %915  ;;  %v1268_v24 = vsub.f32 %v252_v18, %v351_v13  ;;  %v353_v26 = vmul.f32 0.6931472, %v914_v16  ;;  %v326_v13 = vmul.f32 1.442695, %v296_v59 }
 0x11b   :  { %v1257_v17 = vsub.f32 %v251_v6, %v349_v9  ;;  %v394_v19 = vsub.f32 %v1251_v8, %v1205_v4  ;;  %v253_v4 = vmin.f32 %v1209_v7, 0.0  ;;  %v335_v31 = vadd.f32 1.0, %v916_v23 }
 0x11c   :  { %v396_v36 = vsub.f32 %v1268_v24, %v1202_v2  ;;  %v320_v2 = vmul.f32 1.442695, %v293_v40  ;;  %v255_v6 = vmin.f32 %v1218_v25, 0.0 }
 0x11d   :  { %v395_v22 = vsub.f32 %v1257_v17, %v1213_v10  ;;  %538 = vmatprep.mubr.f32.mxu0 %v394_v19  ;;  %v918_v10 = vpop.eup %917  ;;  %v1276_v34 = vsub.f32 %v253_v4, %v353_v26  ;;  %925 = vlog2.f32 %v335_v31  ;;  %v256_v26 = vmin.f32 %v1221_v30, 0.0 }
 0x11e   :  { %539 = vmatmul.mubr.f32.vlgmr.msra.gmra.mrb[16].mxu0 %v1251_v8  ;;  %v920_v38 = vpop.eup %919  ;;  %v336_v41 = vadd.f32 1.0, %v918_v10  ;;  %927 = vpow2.f32 %v316_v35 }
 0x11f   :  { %543 = vmatprep.mubr.f32.mxu0 %v395_v22  ;;  %v397_v42 = vsub.f32 %v1276_v34, %v1209_v7  ;;  %v922_v44 = vpop.eup %921  ;;  %v334_v45 = vadd.f32 1.0, %v920_v38  ;;  %929 = vpow2.f32 %v318_v39  ;;  %v322_v7 = vmul.f32 1.442695, %v294_v47 }
 0x120   :  { %931 = vlog2.f32 %v336_v41  ;;  %v337_v49 = vadd.f32 1.0, %v922_v44  ;;  %v924_v50 = vpop.eup %923 }
 0x121   :  { %933 = vlog2.f32 %v334_v45  ;;  %v338_v57 = vadd.f32 1.0, %v924_v50 }
 0x122   :  { %544 = vmatmul.mubr.f32.gmra.mrb[18].mxu0 %v1257_v17  ;;  %935 = vpow2.f32 %v320_v2 }
 0x123   :  { %548 = vmatprep.mubr.f32.mxu0 %v396_v36  ;;  %937 = vlog2.f32 %v337_v49  ;;  %v257_v36 = vmin.f32 %v1229_v43, 0.0 }
 0x124   :  { %939 = vpow2.f32 %v322_v7 }
 0x125   :  { %941 = vlog2.f32 %v338_v57 }
 0x126   :  { %549 = vmatmul.mubr.f32.gmra.mrb[20].mxu0 %v1268_v24  ;;  %943 = vpow2.f32 %v324_v63  ;;  %v261_v63 = vmin.f32 %v1264_v21, 0.0 }
 0x127   :  { %553 = vmatprep.mubr.f32.mxu0 %v397_v42  ;;  %v926_v54 = vpop.eup %925 }
 0x128   :  { %v928_v58 = vpop.eup %927  ;;  %v357_v60 = vmul.f32 0.6931472, %v926_v54 }
 0x129   :  { %v930_v1 = vpop.eup %929  ;;  %v339_v3 = vadd.f32 1.0, %v928_v58 }
 0x12a   :  { %554 = vmatmul.mubr.f32.gmra.mrb[22].mxu0 %v1276_v34  ;;  %v932_v5 = vpop.eup %931  ;;  %v1291_v14 = vsub.f32 %v255_v6, %v357_v60  ;;  %v340_v18 = vadd.f32 1.0, %v930_v1  ;;  %v262_v6 = vmin.f32 %v1274_v33, 0.0 }
 0x12b   :  { %v934_v9 = vpop.eup %933  ;;  %945 = vlog2.f32 %v339_v3  ;;  %v359_v20 = vmul.f32 0.6931472, %v932_v5 }
 0x12c   :  { %v355_v16 = vmul.f32 0.6931472, %v934_v9  ;;  %v936_v19 = vpop.eup %935  ;;  %947 = vpow2.f32 %v326_v13  ;;  %v399_v4 = vsub.f32 %v1291_v14, %v1218_v25 }
 0x12d   :  { %v938_v23 = vpop.eup %937  ;;  %949 = vlog2.f32 %v340_v18  ;;  %v341_v31 = vadd.f32 1.0, %v936_v19  ;;  %v1300_v28 = vsub.f32 %v256_v26, %v359_v20  ;;  %v264_v20 = vmin.f32 %v1233_v46, 0.0 }
 0x12e   :  { %v1293_v22 = vsub.f32 %v254_v11, %v355_v16  ;;  %v940_v32 = vpop.eup %939  ;;  %v361_v10 = vmul.f32 0.6931472, %v938_v23  ;;  %951 = vpow2.f32 %v328_v27  ;;  %v265_v27 = vmin.f32 %v1236_v51, 0.0 }
 0x12f   :  { %v942_v35 = vpop.eup %941  ;;  %953 = vlog2.f32 %v341_v31  ;;  %v342_v38 = vadd.f32 1.0, %v940_v32  ;;  %v400_v40 = vsub.f32 %v1300_v28, %v1221_v30  ;;  %v259_v30 = vmin.f32 %v1247_v62, 0.0 }
 0x130   :  { %v398_v29 = vsub.f32 %v1293_v22, %v1225_v37  ;;  %v944_v37 = vpop.eup %943  ;;  %v1304_v39 = vsub.f32 %v257_v36, %v361_v10  ;;  %v363_v25 = vmul.f32 0.6931472, %v942_v35  ;;  %v410_v31 = vmul.f32 1.442695, %v1251_v8 }
 0x131   :  { %955 = vlog2.f32 %v342_v38  ;;  %v343_v42 = vadd.f32 1.0, %v944_v37  ;;  %v651_v37 = vlaneseq }
 0x132   :  { %558 = vmatprep.mubr.f32.mxu1 %v398_v29  ;;  %v1310_v45 = vsub.f32 %v258_v0, %v363_v25  ;;  %v401_v47 = vsub.f32 %v1304_v39, %v1229_v43  ;;  %v260_v43 = vmin.f32 %v1254_v12, 0.0 }
 0x133   :  { %559 = vmatmul.mubr.f32.vlgmr.msra.gmra.mrb[0].mxu1 %v1293_v22  ;;  %957 = vlog2.f32 %v343_v42  ;;  %v1364_v42 = vand.u32 127, %v651_v37 }
 0x134   :  { %563 = vmatprep.mubr.f32.mxu1 %v399_v4  ;;  %v402_v53 = vsub.f32 %v1310_v45, %v1240_v55 }
 0x135   :  { %v946_v41 = vpop.eup %945  ;;  %vm653_vm0 = vcmp.lt.s32.totalorder %v1364_v42, 7 }
 0x136   :  { %v948_v44 = vpop.eup %947  ;;  %v365_v2 = vmul.f32 0.6931472, %v946_v41  ;;  %v414_v41 = vmul.f32 1.442695, %v1268_v24 }
 0x137   :  { %564 = vmatmul.mubr.f32.gmra.mrb[2].mxu1 %v1291_v14  ;;  %v950_v48 = vpop.eup %949  ;;  %v344_v49 = vadd.f32 1.0, %v948_v44 }
 0x138   :  { %568 = vmatprep.mubr.f32.mxu1 %v400_v40  ;;  %v952_v50 = vpop.eup %951  ;;  %v367_v52 = vmul.f32 0.6931472, %v950_v48  ;;  %v1316_v7 = vsub.f32 %v259_v30, %v365_v2 }
 0x139   :  { %v954_v54 = vpop.eup %953  ;;  %959 = vlog2.f32 %v344_v49  ;;  %v345_v57 = vadd.f32 1.0, %v952_v50 }
 0x13a   :  { %v1322_v58 = vsub.f32 %v260_v43, %v367_v52  ;;  %v369_v59 = vmul.f32 0.6931472, %v954_v54  ;;  %v403_v60 = vsub.f32 %v1316_v7, %v1247_v62 }
 0x13b   :  { %569 = vmatmul.mubr.f32.gmra.mrb[4].mxu1 %v1300_v28  ;;  %v956_v61 = vpop.eup %955  ;;  %961 = vlog2.f32 %v345_v57 }
 0x13c   :  { %573 = vmatprep.mubr.f32.mxu1 %v401_v47  ;;  %v1328_v55 = vsub.f32 %v261_v63, %v369_v59  ;;  %v371_v1 = vmul.f32 0.6931472, %v956_v61  ;;  %v404_v3 = vsub.f32 %v1322_v58, %v1254_v12  ;;  %963 = vpow2.f32 %v410_v31 }
 0x13d   :  { %v958_v5 = vpop.eup %957  ;;  %v416_v47 = vmul.f32 1.442695, %v1276_v34 }
 0x13e   :  { %v1334_v62 = vsub.f32 %v262_v6, %v371_v1  ;;  %v373_v9 = vmul.f32 0.6931472, %v958_v5  ;;  %v405_v11 = vsub.f32 %v1328_v55, %v1264_v21  ;;  %v418_v1 = vmul.f32 1.442695, %v1293_v22 }
 0x13f   :  { %574 = vmatmul.mubr.f32.gmra.mrb[6].mxu1 %v1304_v39 }
 0x140   :  { %578 = vmatprep.mubr.f32.mxu1 %v402_v53  ;;  %v1340_v12 = vsub.f32 %v263_v15, %v373_v9  ;;  %v406_v18 = vsub.f32 %v1334_v62, %v1274_v33 }
 0x142   :  { %v407_v26 = vsub.f32 %v1340_v12, %v1243_v56 }
 0x143   :  { %579 = vmatmul.mubr.f32.gmra.mrb[8].mxu1 %v1310_v45  ;;  %v960_v13 = vpop.eup %959 }
 0x144   :  { %583 = vmatprep.mubr.f32.mxu1 %v403_v60  ;;  %v375_v16 = vmul.f32 0.6931472, %v960_v13 }
 0x145   :  { %v962_v19 = vpop.eup %961 }
 0x146   :  { %v1346_v23 = vsub.f32 %v264_v20, %v375_v16  ;;  %v377_v21 = vmul.f32 0.6931472, %v962_v19  ;;  %v964_v30 = vpop.eup %963  ;;  %v422_v19 = vmul.f32 1.442695, %v1300_v28 }
 0x147   :  { %584 = vmatmul.mubr.f32.gmra.mrb[10].mxu1 %v1316_v7 }
 0x148   :  { %588 = vmatprep.mubr.f32.mxu1 %v404_v3  ;;  %v1352_v29 = vsub.f32 %v265_v27, %v377_v21  ;;  %v408_v33 = vsub.f32 %v1346_v23, %v1233_v46  ;;  %v412_v46 = vmul.f32 1.442695, %v1257_v17  ;;  %v424_v27 = vmul.f32 1.442695, %v1304_v39 }
 0x14a   :  { %v409_v4 = vsub.f32 %v1352_v29, %v1236_v51 }
 0x14b   :  { %589 = vmatmul.mubr.f32.gmra.mrb[12].mxu1 %v1322_v58 }
 0x14c   :  { %593 = vmatprep.mubr.f32.mxu1 %v405_v11  ;;  %v420_v11 = vmul.f32 1.442695, %v1291_v14 }
 0x14f   :  { %594 = vmatmul.mubr.f32.gmra.mrb[14].mxu1 %v1328_v55 }
 0x150   :  { %598 = vmatprep.mubr.f32.mxu1 %v406_v18 }
 0x153   :  { %599 = vmatmul.mubr.f32.gmra.mrb[16].mxu1 %v1334_v62 }
 0x154   :  { %603 = vmatprep.mubr.f32.mxu1 %v407_v26 }
 0x157   :  { %604 = vmatmul.mubr.f32.gmra.mrb[18].mxu1 %v1340_v12 }
 0x158   :  { %608 = vmatprep.mubr.f32.mxu1 %v408_v33 }
 0x15b   :  { %609 = vmatmul.mubr.f32.gmra.mrb[20].mxu1 %v1346_v23 }
 0x15c   :  { %613 = vmatprep.mubr.f32.mxu1 %v409_v4 }
 0x15f   :  { %614 = vmatmul.mubr.f32.gmra.mrb[22].mxu1 %v1352_v29 }
 0x1f1   :  { %v755_v56 = vpop.f32.mrb[16].mxu0 }
 0x1f2   :  { %v756_v32 = vpop.f32.mrb[17].mxu0 }
 0x1f3   :  { %v757_v10 = vadd.f32 %v756_v32, %v755_v56 }
 0x1f5   :  { %v619_v35 = vmul.f32 1.442695, %v757_v10  ;;  %v758_v36 = vpop.f32.mrb[18].mxu0  ;;  %v426_v10 = vmul.f32 1.442695, %v1310_v45 }
 0x1f6   :  { %v759_v38 = vpop.f32.mrb[19].mxu0 }
 0x1f7   :  { %965 = vpow2.f32 %v619_v35  ;;  %v760_v25 = vadd.f32 %v759_v38, %v758_v36 }
 0x1f8   :  { %967 = vpow2.f32 %v412_v46 }
 0x1f9   :  { %v621_v51 = vmul.f32 1.442695, %v760_v25  ;;  %v761_v40 = vpop.f32.mrb[20].mxu0  ;;  %v428_v25 = vmul.f32 1.442695, %v1316_v7 }
 0x1fa   :  { %v762_v0 = vpop.f32.mrb[21].mxu0 }
 0x1fb   :  { %969 = vpow2.f32 %v621_v51  ;;  %v763_v8 = vadd.f32 %v762_v0, %v761_v40 }
 0x1fc   :  { %971 = vpow2.f32 %v414_v41 }
 0x1fd   :  { %v623_v44 = vmul.f32 1.442695, %v763_v8  ;;  %v764_v2 = vpop.f32.mrb[22].mxu0 }
 0x1fe   :  { %v765_v17 = vpop.f32.mrb[23].mxu0 }
 0x1ff   :  { %973 = vpow2.f32 %v623_v44  ;;  %v766_v48 = vadd.f32 %v765_v17, %v764_v2  ;;  %v430_v2 = vmul.f32 1.442695, %v1322_v58 }
 0x200   :  { %975 = vpow2.f32 %v416_v47 }
 0x201   :  { %v966_v49 = vpop.eup %965  ;;  %v625_v50 = vmul.f32 1.442695, %v766_v48 }
 0x202   :  { %v654_v24 = vsel %vm653_vm0, %v964_v30, %v966_v49  ;;  %v968_v52 = vpop.eup %967 }
 0x203   :  { %670 = vst [vmem:[%s1464_s4] sm:$0xff] %v654_v24  ;;  %977 = vpow2.f32 %v625_v50  ;;  %v432_v24 = vmul.f32 1.442695, %v1328_v55 }
 0x204   :  { %979 = vpow2.f32 %v418_v1 }
 0x205   :  { %v970_v53 = vpop.eup %969 }
 0x206   :  { %v655_v34 = vsel %vm653_vm0, %v968_v52, %v970_v53  ;;  %v972_v54 = vpop.eup %971  ;;  %v767_v63 = vpop.f32.mrb[0].mxu1 }
 0x207   :  { %671 = vst [vmem:[%s1464_s4 + $0x8] sm:$0xff] %v655_v34  ;;  %v768_v3 = vpop.f32.mrb[1].mxu1 }
 0x208   :  { %v769_v5 = vadd.f32 %v768_v3, %v767_v63 }
 0x209   :  { %v974_v43 = vpop.eup %973 }
 0x20a   :  { %v656_v57 = vsel %vm653_vm0, %v972_v54, %v974_v43  ;;  %v976_v59 = vpop.eup %975  ;;  %v627_v6 = vmul.f32 1.442695, %v769_v5  ;;  %v770_v9 = vpop.f32.mrb[2].mxu1 }
 0x20b   :  { %672 = vst [vmem:[%s1464_s4 + $0x10] sm:$0xff] %v656_v57  ;;  %v771_v13 = vpop.f32.mrb[3].mxu1 }
 0x20c   :  { %981 = vpow2.f32 %v627_v6  ;;  %v772_v15 = vadd.f32 %v771_v13, %v770_v9  ;;  %v436_v6 = vmul.f32 1.442695, %v1340_v12 }
 0x20d   :  { %v978_v60 = vpop.eup %977  ;;  %983 = vpow2.f32 %v420_v11 }
 0x20e   :  { %v657_v61 = vsel %vm653_vm0, %v976_v59, %v978_v60  ;;  %v629_v16 = vmul.f32 1.442695, %v772_v15  ;;  %v773_v18 = vpop.f32.mrb[4].mxu1  ;;  %v980_v4 = vpop.eup %979  ;;  %v434_v59 = vmul.f32 1.442695, %v1334_v62 }
 0x20f   :  { %673 = vst [vmem:[%s1464_s4 + $0x18] sm:$0xff] %v657_v61  ;;  %v774_v20 = vpop.f32.mrb[5].mxu1 }
 0x210   :  { %985 = vpow2.f32 %v629_v16  ;;  %v775_v21 = vadd.f32 %v774_v20, %v773_v18 }
 0x211   :  { %987 = vpow2.f32 %v422_v19  ;;  %v438_v19 = vmul.f32 1.442695, %v1346_v23 }
 0x212   :  { %v631_v26 = vmul.f32 1.442695, %v775_v21  ;;  %v776_v22 = vpop.f32.mrb[6].mxu1 }
 0x213   :  { %v777_v33 = vpop.f32.mrb[7].mxu1 }
 0x214   :  { %989 = vpow2.f32 %v631_v26  ;;  %v778_v14 = vadd.f32 %v777_v33, %v776_v22 }
 0x215   :  { %991 = vpow2.f32 %v424_v27 }
 0x216   :  { %v982_v56 = vpop.eup %981  ;;  %v633_v31 = vmul.f32 1.442695, %v778_v14  ;;  %v779_v32 = vpop.f32.mrb[8].mxu1  ;;  %v440_v14 = vmul.f32 1.442695, %v1352_v29 }
 0x217   :  { %v658_v28 = vsel %vm653_vm0, %v980_v4, %v982_v56  ;;  %v780_v35 = vpop.f32.mrb[9].mxu1  ;;  %v984_v36 = vpop.eup %983 }
 0x218   :  { %674 = vst [vmem:[%s1464_s4 + $0x20] sm:$0xff] %v658_v28  ;;  %993 = vpow2.f32 %v633_v31  ;;  %v781_v39 = vadd.f32 %v780_v35, %v779_v32 }
 0x219   :  { %995 = vpow2.f32 %v426_v10 }
 0x21a   :  { %v986_v46 = vpop.eup %985  ;;  %v635_v38 = vmul.f32 1.442695, %v781_v39  ;;  %v782_v37 = vpop.f32.mrb[10].mxu1 }
 0x21b   :  { %v659_v45 = vsel %vm653_vm0, %v984_v36, %v986_v46  ;;  %v783_v51 = vpop.f32.mrb[11].mxu1  ;;  %v988_v41 = vpop.eup %987 }
 0x21c   :  { %675 = vst [vmem:[%s1464_s4 + $0x28] sm:$0xff] %v659_v45  ;;  %997 = vpow2.f32 %v635_v38  ;;  %v784_v40 = vadd.f32 %v783_v51, %v782_v37 }
 0x21d   :  { %999 = vpow2.f32 %v428_v25 }
 0x21e   :  { %v990_v0 = vpop.eup %989  ;;  %v637_v8 = vmul.f32 1.442695, %v784_v40  ;;  %v785_v44 = vpop.f32.mrb[12].mxu1 }
 0x21f   :  { %v660_v7 = vsel %vm653_vm0, %v988_v41, %v990_v0  ;;  %v786_v47 = vpop.f32.mrb[13].mxu1  ;;  %v992_v48 = vpop.eup %991 }
 0x220   :  { %676 = vst [vmem:[%s1464_s4 + $0x30] sm:$0xff] %v660_v7  ;;  %1001 = vpow2.f32 %v637_v8  ;;  %v787_v17 = vadd.f32 %v786_v47, %v785_v44 }
 0x221   :  { %1003 = vpow2.f32 %v430_v2 }
 0x222   :  { %v994_v30 = vpop.eup %993  ;;  %v639_v49 = vmul.f32 1.442695, %v787_v17  ;;  %v788_v50 = vpop.f32.mrb[14].mxu1 }
 0x223   :  { %v661_v58 = vsel %vm653_vm0, %v992_v48, %v994_v30  ;;  %v789_v52 = vpop.f32.mrb[15].mxu1  ;;  %v996_v34 = vpop.eup %995 }
 0x224   :  { %677 = vst [vmem:[%s1464_s4 + $0x38] sm:$0xff] %v661_v58  ;;  %1005 = vpow2.f32 %v639_v49  ;;  %v790_v53 = vadd.f32 %v789_v52, %v788_v50 }
 0x225   :  { %1007 = vpow2.f32 %v432_v24 }
 0x226   :  { %v998_v54 = vpop.eup %997  ;;  %v641_v43 = vmul.f32 1.442695, %v790_v53  ;;  %v791_v57 = vpop.f32.mrb[16].mxu1 }
 0x227   :  { %v662_v55 = vsel %vm653_vm0, %v996_v34, %v998_v54  ;;  %v792_v60 = vpop.f32.mrb[17].mxu1  ;;  %v1000_v63 = vpop.eup %999 }
 0x228   :  { %678 = vst [vmem:[%s1464_s4 + $0x40] sm:$0xff] %v662_v55  ;;  %1009 = vpow2.f32 %v641_v43  ;;  %v793_v61 = vadd.f32 %v792_v60, %v791_v57 }
 0x229   :  { %1011 = vpow2.f32 %v434_v59 }
 0x22a   :  { %v1002_v1 = vpop.eup %1001  ;;  %v643_v3 = vmul.f32 1.442695, %v793_v61  ;;  %v794_v5 = vpop.f32.mrb[18].mxu1 }
 0x22b   :  { %v663_v62 = vsel %vm653_vm0, %v1000_v63, %v1002_v1  ;;  %v795_v9 = vpop.f32.mrb[19].mxu1  ;;  %v1004_v13 = vpop.eup %1003 }
 0x22c   :  { %679 = vst [vmem:[%s1464_s4 + $0x48] sm:$0xff] %v663_v62  ;;  %1013 = vpow2.f32 %v643_v3  ;;  %v796_v11 = vadd.f32 %v795_v9, %v794_v5 }
 0x22d   :  { %1015 = vpow2.f32 %v436_v6 }
 0x22e   :  { %v1006_v15 = vpop.eup %1005  ;;  %v645_v16 = vmul.f32 1.442695, %v796_v11  ;;  %v797_v18 = vpop.f32.mrb[20].mxu1 }
 0x22f   :  { %v664_v12 = vsel %vm653_vm0, %v1004_v13, %v1006_v15  ;;  %v798_v20 = vpop.f32.mrb[21].mxu1  ;;  %v1008_v26 = vpop.eup %1007 }
 0x230   :  { %680 = vst [vmem:[%s1464_s4 + $0x50] sm:$0xff] %v664_v12  ;;  %1017 = vpow2.f32 %v645_v16  ;;  %v799_v21 = vadd.f32 %v798_v20, %v797_v18 }
 0x231   :  { %1019 = vpow2.f32 %v438_v19 }
 0x232   :  { %v1010_v22 = vpop.eup %1009  ;;  %v647_v27 = vmul.f32 1.442695, %v799_v21  ;;  %v800_v33 = vpop.f32.mrb[22].mxu1 }
 0x233   :  { %v665_v23 = vsel %vm653_vm0, %v1008_v26, %v1010_v22  ;;  %v801_v4 = vpop.f32.mrb[23].mxu1  ;;  %v1012_v31 = vpop.eup %1011 }
 0x234   :  { %681 = vst [vmem:[%s1464_s4 + $0x58] sm:$0xff] %v665_v23  ;;  %1021 = vpow2.f32 %v647_v27  ;;  %v802_v56 = vadd.f32 %v801_v4, %v800_v33 }
 0x235   :  { %1023 = vpow2.f32 %v440_v14 }
 0x236   :  { %v1014_v32 = vpop.eup %1013  ;;  %v649_v10 = vmul.f32 1.442695, %v802_v56 }
 0x237   :  { %v666_v28 = vsel %vm653_vm0, %v1012_v31, %v1014_v32  ;;  %v1016_v29 = vpop.eup %1015 }
 0x238   :  { %682 = vst [vmem:[%s1464_s4 + $0x60] sm:$0xff] %v666_v28  ;;  %1025 = vpow2.f32 %v649_v10 }
 0x23a   :  { %v1018_v35 = vpop.eup %1017 }
 0x23b   :  { %v667_v39 = vsel %vm653_vm0, %v1016_v29, %v1018_v35  ;;  %v1020_v36 = vpop.eup %1019 }
 0x23c   :  { %683 = vst [vmem:[%s1464_s4 + $0x68] sm:$0xff] %v667_v39 }
 0x23e   :  { %v1022_v46 = vpop.eup %1021 }
 0x23f   :  { %v668_v38 = vsel %vm653_vm0, %v1020_v36, %v1022_v46  ;;  %v1024_v37 = vpop.eup %1023 }
 0x240   :  { %684 = vst [vmem:[%s1464_s4 + $0x70] sm:$0xff] %v668_v38 }
 0x242   :  { %v1026_v25 = vpop.eup %1025 }
 0x243   :  { %v669_v45 = vsel %vm653_vm0, %v1024_v37, %v1026_v25 }
 0x244   :  { %685 = vst [vmem:[%s1464_s4 + $0x78] sm:$0xff] %v669_v45 }

</bundles_post_ra>
